<compile_context>
chip_gen: v6e
topology: v6e:2x2x1
jax: 0.10.0
libtpu: 0.0.40
codegen_flags: <defaults>
</compile_context>

<pallas_src>
import functools

import jax
import jax.numpy as jnp
from jax import lax
from jax.experimental import pallas as pl
from jax.experimental.pallas import tpu as pltpu


def _cdiv(a, b):
    return (a + b - 1) // b


def _round_up(x, m):
    return _cdiv(x, m) * m


def _reward_classifier_kernel(
    states_ref,  # (TN, S)   f32  row block of the raw state tensor
    acts_ref,    # (A, TN)   f32  lane-dense action block
    w1t_ref,     # (H, S)    bf16 fc1 state-slice weight, transposed
    w2t_ref,     # (H, H)    bf16 fc2 weight, transposed to [out, in]
    small_ref,   # (H, A+4)  f32  [wact^T | b1_fused | b2 | w3 | b3]
    out_ref,     # (1, TN)   f32  lane-dense output row
):
    A = acts_ref.shape[0]

    # ---- fc1 (transposed): pre1^T = w1s^T @ states^T + wact^T @ acts^T + b1f
    # states come straight from HBM as f32 (single pass); bf16 cast is a VPU op.
    states_bf = states_ref[...].astype(jnp.bfloat16)                # (TN, S)
    pre1 = lax.dot_general(                                          # (H, TN)
        w1t_ref[...], states_bf,
        dimension_numbers=(((1,), (1,)), ((), ())),                  # contract S with S
        preferred_element_type=jnp.float32,
    )
    acts = acts_ref[...]                                             # (A, TN) f32
    pre1 = pre1 + small_ref[:, A:A + 1]                              # fused bias (H,1)
    for a in range(A):                                               # A small & static
        pre1 = pre1 + small_ref[:, a:a + 1] * acts[a:a + 1, :]       # VPU outer-product FMA
    x = jnp.maximum(pre1, 0.0)                                       # (H, TN) f32

    # ---- fc2: (H,H) bf16 @ (H,TN) bf16 -> f32, everything lane-dense
    h = jnp.maximum(
        jnp.dot(w2t_ref[...], x.astype(jnp.bfloat16),
                preferred_element_type=jnp.float32)
        + small_ref[:, A + 1:A + 2],
        0.0,
    )                                                                # (H, TN) f32

    # ---- fc3 (H -> 1): VPU multiply + sublane reduce, then sigmoid (EUP)
    logits = (jnp.sum(h * small_ref[:, A + 2:A + 3], axis=0, keepdims=True)
              + small_ref[0:1, A + 3:A + 4])                         # (1, TN)
    out_ref[...] = jax.nn.sigmoid(logits)


@functools.partial(jax.jit, static_argnames=("block_rows",))
def reward_classifier_forward(state, actions, prep, *, block_rows=8192):
    """state: [B, T, S] f32; actions: [B, T, A, 1] int.  Returns [B, T-1, 1]."""
    B, T, S = state.shape
    A = actions.shape[2]
    H = prep["w2t"].shape[0]

    # Compute over all B*T rows (the unused last timestep per episode is only
    # 1/T extra work) so `state` is fed with a *free* reshape: no slice-copy,
    # astype or pad passes over HBM for the big tensor.
    N = B * T
    TN = min(block_rows, max(128, _round_up(_cdiv(N, 2), 128)))  # >=2 blocks when N is large
    G = _cdiv(N, TN)

    states_2d = state.reshape(N, S)                                  # free reshape, stays f32
    acts_t = actions[:, :, :, 0].reshape(N, A).T.astype(jnp.float32)  # tiny (A, N) slab

    if N < TN:  # only possible for tiny inputs (N < 128): cheap pad to one full block
        states_2d = jnp.pad(states_2d, ((0, TN - N), (0, 0)))
        acts_t = jnp.pad(acts_t, ((0, 0), (0, TN - N)))
    # For N >= TN the ragged tail is handled by Pallas' partial last block
    # (out-of-bounds lanes hold garbage that is sliced off below; each output
    # column depends only on its own input row, so no contamination).

    out = pl.pallas_call(
        _reward_classifier_kernel,
        out_shape=jax.ShapeDtypeStruct((1, G * TN), jnp.float32),
        grid_spec=pltpu.PrefetchScalarGridSpec(
            num_scalar_prefetch=0,
            grid=(G,),
            in_specs=[
                # streamed, double-buffered row block of states (one f32 HBM pass)
                pl.BlockSpec((TN, S), lambda i: (i, 0)),
                # lane-dense actions block
                pl.BlockSpec((A, TN), lambda i: (0, i)),
                # constant-index weights: DMA'd once, stay VMEM-resident
                pl.BlockSpec((H, S), lambda i: (0, 0)),
                pl.BlockSpec((H, H), lambda i: (0, 0)),
                pl.BlockSpec((H, A + 4), lambda i: (0, 0)),
            ],
            out_specs=pl.BlockSpec((1, TN), lambda i: (0, i)),       # lane-dense output slab
        ),
        compiler_params=pltpu.CompilerParams(
            # row blocks are independent -> shard across v7x's two TensorCores
            dimension_semantics=("parallel",),
            # ~14 MiB/step at TN=8192; 48 MiB leaves headroom on v7x's 64 MiB VMEM
            vmem_limit_bytes=48 * 1024 * 1024,
        ),
    )(states_2d, acts_t, prep["w1t"], prep["w2t"], prep["small"])

    # Drop padded columns, then drop the last timestep of each episode.
    return out[0, :N].reshape(B, T)[:, :T - 1, None]


def init_params(key, state_dim, sub_reward_dim, n_agents, action_dim=16):
    """Raw parameters, stored as [in, out] (transposed vs. PyTorch)."""
    ks = jax.random.split(key, 10)

    def lin(kw, kb, fan_in, fan_out):
        bound = 1.0 / jnp.sqrt(fan_in)
        w = jax.random.uniform(kw, (fan_in, fan_out), jnp.float32, -bound, bound)
        b = jax.random.uniform(kb, (1, fan_out), jnp.float32, -bound, bound)
        return w, b

    input_shape = state_dim + action_dim
    w1, b1 = lin(ks[0], ks[1], input_shape, sub_reward_dim)
    w2, b2 = lin(ks[2], ks[3], sub_reward_dim, sub_reward_dim)
    w3, b3 = lin(ks[4], ks[5], sub_reward_dim, 1)
    w4, b4 = lin(ks[6], ks[7], n_agents, action_dim)
    w5, b5 = lin(ks[8], ks[9], action_dim, action_dim)
    return dict(w1=w1, b1=b1, w2=w2, b2=b2, w3=w3, b3=b3,
                w4=w4, b4=b4, w5=w5, b5=b5)


def prepare_params(raw):
    """Fold fc4/fc5 into fc1's action slice; transpose/pack for lane-dense compute."""
    w1, b1 = raw["w1"], raw["b1"]
    w2, b2 = raw["w2"], raw["b2"]
    w3, b3 = raw["w3"], raw["b3"]
    w4, b4 = raw["w4"], raw["b4"]
    w5, b5 = raw["w5"], raw["b5"]
    action_dim = w4.shape[1]
    S = w1.shape[0] - action_dim
    H = w1.shape[1]
    w1s, w1a = w1[:S], w1[S:]
    # enc = acts @ (w4 @ w5) + (b4 @ w5 + b5); enc @ w1a folds exactly into:
    w_act = w4 @ w5 @ w1a                               # (A, H)
    b1f = b1 + (b4 @ w5 + b5) @ w1a                     # (1, H)
    small = jnp.concatenate([
        w_act.T,                                        # (H, A)
        b1f.T,                                          # (H, 1) fused fc1 bias
        b2.T,                                           # (H, 1)
        w3,                                             # (H, 1)
        jnp.full((H, 1), b3[0, 0]),                     # (H, 1) scalar b3 (row 0 used)
    ], axis=1).astype(jnp.float32)                      # (H, A+4)
    return {
        "w1t": w1s.T.astype(jnp.bfloat16),              # (H, S)
        "w2t": w2.T.astype(jnp.bfloat16),               # (H_out, H_in)
        "small": small,
    }


def _reference_forward(state, actions, raw):
    """Pure-JAX f32 reference matching the PyTorch forward semantics."""
    states = state[:, :-1]
    acts = actions[:, :-1, :, 0].astype(jnp.float32)
    enc1 = acts @ raw["w4"] + raw["b4"]
    enc = enc1 @ raw["w5"] + raw["b5"]
    inputs = jnp.concatenate([states, enc], axis=-1)
    x = jax.nn.relu(inputs @ raw["w1"] + raw["b1"])
    h = jax.nn.relu(x @ raw["w2"] + raw["b2"])
    return jax.nn.sigmoid(h @ raw["w3"] + raw["b3"])


if __name__ == "__main__":
    # small shapes consistent with the module:
    #   state_dim = 32, classfiydim = 32, n_agents = 4, actionDim = 16, T = 9
    B, T, state_dim, sub_reward_dim, n_agents = 2, 9, 32, 32, 4

    key = jax.random.PRNGKey(0)
    k_state, k_act, k_params, k_state2, k_act2 = jax.random.split(key, 5)

    raw = init_params(k_params, state_dim, sub_reward_dim, n_agents)
    prep = prepare_params(raw)

    state = jax.random.normal(k_state, (B, T, state_dim), jnp.float32)
    actions = jax.random.randint(k_act, (B, T, n_agents, 1), 0, 5).astype(jnp.int32)

    c = jax.block_until_ready(reward_classifier_forward(state, actions, prep))
    ref = _reference_forward(state, actions, raw)
    assert c.shape == (B, T - 1, 1), c.shape
    # bf16 matmuls (f32 accumulate) -> ~1e-2 agreement with the f32 reference
    assert jnp.allclose(c, ref, atol=2e-2, rtol=2e-2), float(jnp.max(jnp.abs(c - ref)))

    # Larger run: multi-block grid + ragged (partial) last block, N = 3*1025 = 3075.
    B2, T2 = 3, 1025
    state2 = jax.random.normal(k_state2, (B2, T2, state_dim), jnp.float32)
    actions2 = jax.random.randint(k_act2, (B2, T2, n_agents, 1), 0, 5).astype(jnp.int32)
    c2 = jax.block_until_ready(reward_classifier_forward(state2, actions2, prep))
    ref2 = _reference_forward(state2, actions2, raw)
    assert c2.shape == (B2, T2 - 1, 1), c2.shape
    assert jnp.allclose(c2, ref2, atol=2e-2, rtol=2e-2), float(jnp.max(jnp.abs(c2 - ref2)))

    print("KERNEL_OK")
</pallas_src>

<mosaic_0001>
module attributes {stable_mosaic.version = 11 : i64} {
  func.func @_reward_classifier_kernel(%arg0: i32, %arg1: memref<128x32xf32, #tpu.memory_space<vmem>>, %arg2: memref<4x128xf32, #tpu.memory_space<vmem>>, %arg3: memref<32x32xbf16, #tpu.memory_space<vmem>>, %arg4: memref<32x32xbf16, #tpu.memory_space<vmem>>, %arg5: memref<32x8xf32, #tpu.memory_space<vmem>>, %arg6: memref<1x128xf32, #tpu.memory_space<vmem>>) attributes {dimension_semantics = [#tpu.dimension_semantics<parallel>], iteration_bounds = array<i64: 1>, scalar_prefetch = 0 : i64, scratch_operands = 0 : i64, tpu.core_type = #tpu.core_type<tc>, window_params = [{transform_indices = @transform_0, window_bounds = array<i64: 128, 32>}, {transform_indices = @transform_1, window_bounds = array<i64: 4, 128>}, {pipeline_mode = #tpu.pipeline_mode<synchronous>, transform_indices = @transform_2, window_bounds = array<i64: 32, 32>}, {pipeline_mode = #tpu.pipeline_mode<synchronous>, transform_indices = @transform_3, window_bounds = array<i64: 32, 32>}, {pipeline_mode = #tpu.pipeline_mode<synchronous>, transform_indices = @transform_4, window_bounds = array<i64: 32, 8>}, {transform_indices = @transform_5, window_bounds = array<i64: 1, 128>}]} {
    %c0 = arith.constant 0 : index
    %c0_0 = arith.constant 0 : index
    %0 = vector.load %arg1[%c0, %c0_0] : memref<128x32xf32, #tpu.memory_space<vmem>>, vector<128x32xf32>
    %1 = arith.truncf %0 : vector<128x32xf32> to vector<128x32xbf16>
    %c0_1 = arith.constant 0 : index
    %c0_2 = arith.constant 0 : index
    %2 = vector.load %arg3[%c0_1, %c0_2] : memref<32x32xbf16, #tpu.memory_space<vmem>>, vector<32x32xbf16>
    %cst = arith.constant dense<0.000000e+00> : vector<32x128xf32>
    %3 = tpu.matmul %2, %1, %cst {dimension_numbers = #tpu.dot_dimension_numbers<[1], [1], [0], [0], [0, 0, 1, 0], [], []>} : vector<32x32xbf16>, vector<128x32xbf16>, vector<32x128xf32> -> vector<32x128xf32>
    %c0_3 = arith.constant 0 : index
    %c0_4 = arith.constant 0 : index
    %4 = vector.load %arg2[%c0_3, %c0_4] : memref<4x128xf32, #tpu.memory_space<vmem>>, vector<4x128xf32>
    %c0_5 = arith.constant 0 : index
    %c4 = arith.constant 4 : index
    %5 = vector.load %arg5[%c0_5, %c4] : memref<32x8xf32, #tpu.memory_space<vmem>>, vector<32x1xf32>
    %6 = vector.broadcast %5 : vector<32x1xf32> to vector<32x128xf32>
    %7 = arith.addf %3, %6 : vector<32x128xf32>
    %c0_6 = arith.constant 0 : index
    %c0_7 = arith.constant 0 : index
    %8 = vector.load %arg5[%c0_6, %c0_7] : memref<32x8xf32, #tpu.memory_space<vmem>>, vector<32x1xf32>
    %9 = vector.extract_strided_slice %4 {offsets = [0, 0], sizes = [1, 128], strides = [1, 1]} : vector<4x128xf32> to vector<1x128xf32>
    %10 = vector.broadcast %8 : vector<32x1xf32> to vector<32x128xf32>
    %11 = vector.broadcast %9 : vector<1x128xf32> to vector<32x128xf32>
    %12 = arith.mulf %10, %11 : vector<32x128xf32>
    %13 = arith.addf %7, %12 : vector<32x128xf32>
    %c0_8 = arith.constant 0 : index
    %c1 = arith.constant 1 : index
    %14 = vector.load %arg5[%c0_8, %c1] : memref<32x8xf32, #tpu.memory_space<vmem>>, vector<32x1xf32>
    %15 = vector.extract_strided_slice %4 {offsets = [1, 0], sizes = [1, 128], strides = [1, 1]} : vector<4x128xf32> to vector<1x128xf32>
    %16 = vector.broadcast %14 : vector<32x1xf32> to vector<32x128xf32>
    %17 = vector.broadcast %15 : vector<1x128xf32> to vector<32x128xf32>
    %18 = arith.mulf %16, %17 : vector<32x128xf32>
    %19 = arith.addf %13, %18 : vector<32x128xf32>
    %c0_9 = arith.constant 0 : index
    %c2 = arith.constant 2 : index
    %20 = vector.load %arg5[%c0_9, %c2] : memref<32x8xf32, #tpu.memory_space<vmem>>, vector<32x1xf32>
    %21 = vector.extract_strided_slice %4 {offsets = [2, 0], sizes = [1, 128], strides = [1, 1]} : vector<4x128xf32> to vector<1x128xf32>
    %22 = vector.broadcast %20 : vector<32x1xf32> to vector<32x128xf32>
    %23 = vector.broadcast %21 : vector<1x128xf32> to vector<32x128xf32>
    %24 = arith.mulf %22, %23 : vector<32x128xf32>
    %25 = arith.addf %19, %24 : vector<32x128xf32>
    %c0_10 = arith.constant 0 : index
    %c3 = arith.constant 3 : index
    %26 = vector.load %arg5[%c0_10, %c3] : memref<32x8xf32, #tpu.memory_space<vmem>>, vector<32x1xf32>
    %27 = vector.extract_strided_slice %4 {offsets = [3, 0], sizes = [1, 128], strides = [1, 1]} : vector<4x128xf32> to vector<1x128xf32>
    %28 = vector.broadcast %26 : vector<32x1xf32> to vector<32x128xf32>
    %29 = vector.broadcast %27 : vector<1x128xf32> to vector<32x128xf32>
    %30 = arith.mulf %28, %29 : vector<32x128xf32>
    %31 = arith.addf %25, %30 : vector<32x128xf32>
    %cst_11 = arith.constant 0.000000e+00 : f32
    %32 = vector.broadcast %cst_11 : f32 to vector<32x128xf32>
    %33 = arith.maximumf %31, %32 : vector<32x128xf32>
    %c0_12 = arith.constant 0 : index
    %c0_13 = arith.constant 0 : index
    %34 = vector.load %arg4[%c0_12, %c0_13] : memref<32x32xbf16, #tpu.memory_space<vmem>>, vector<32x32xbf16>
    %35 = arith.truncf %33 : vector<32x128xf32> to vector<32x128xbf16>
    %cst_14 = arith.constant dense<0.000000e+00> : vector<32x128xf32>
    %36 = tpu.matmul %34, %35, %cst_14 {dimension_numbers = #tpu.dot_dimension_numbers<[1], [0], [0], [1], [0, 0, 1, 1], [], []>} : vector<32x32xbf16>, vector<32x128xbf16>, vector<32x128xf32> -> vector<32x128xf32>
    %c0_15 = arith.constant 0 : index
    %c5 = arith.constant 5 : index
    %37 = vector.load %arg5[%c0_15, %c5] : memref<32x8xf32, #tpu.memory_space<vmem>>, vector<32x1xf32>
    %38 = vector.broadcast %37 : vector<32x1xf32> to vector<32x128xf32>
    %39 = arith.addf %36, %38 : vector<32x128xf32>
    %cst_16 = arith.constant 0.000000e+00 : f32
    %40 = vector.broadcast %cst_16 : f32 to vector<32x128xf32>
    %41 = arith.maximumf %39, %40 : vector<32x128xf32>
    %c0_17 = arith.constant 0 : index
    %c6 = arith.constant 6 : index
    %42 = vector.load %arg5[%c0_17, %c6] : memref<32x8xf32, #tpu.memory_space<vmem>>, vector<32x1xf32>
    %43 = vector.broadcast %42 : vector<32x1xf32> to vector<32x128xf32>
    %44 = arith.mulf %41, %43 : vector<32x128xf32>
    %cst_18 = arith.constant dense<0.000000e+00> : vector<128xf32>
    %45 = vector.multi_reduction <add>, %44, %cst_18 [0] : vector<32x128xf32> to vector<128xf32>
    %46 = vector.shape_cast %45 : vector<128xf32> to vector<1x128xf32>
    %c0_19 = arith.constant 0 : index
    %c7 = arith.constant 7 : index
    %47 = vector.load %arg5[%c0_19, %c7] : memref<32x8xf32, #tpu.memory_space<vmem>>, vector<1x1xf32>
    %48 = vector.broadcast %47 : vector<1x1xf32> to vector<1x128xf32>
    %49 = arith.addf %46, %48 : vector<1x128xf32>
    %50 = arith.negf %49 : vector<1x128xf32>
    %51 = math.exp %50 : vector<1x128xf32>
    %cst_20 = arith.constant 1.000000e+00 : f32
    %52 = vector.broadcast %cst_20 : f32 to vector<1x128xf32>
    %53 = arith.addf %52, %51 : vector<1x128xf32>
    %54 = arith.divf %52, %53 : vector<1x128xf32>
    %c0_21 = arith.constant 0 : index
    %c0_22 = arith.constant 0 : index
    %55 = vector.load %arg6[%c0_21, %c0_22] : memref<1x128xf32, #tpu.memory_space<vmem>>, vector<1x128xf32>
    tpu.vector_store %arg6[%c0_21, %c0_22], %54 {strides = array<i32>} : memref<1x128xf32, #tpu.memory_space<vmem>>, vector<1x128xf32>,
    return
  }
  func.func @transform_0(%arg0: i32) -> (i32, i32) {
    %c0_i32 = arith.constant 0 : i32
    %c0_i32_0 = arith.constant 0 : i32
    return %arg0, %c0_i32 : i32, i32
  }
  func.func @transform_1(%arg0: i32) -> (i32, i32) {
    %c0_i32 = arith.constant 0 : i32
    %c0_i32_0 = arith.constant 0 : i32
    return %c0_i32, %arg0 : i32, i32
  }
  func.func @transform_2(%arg0: i32) -> (i32, i32) {
    %c0_i32 = arith.constant 0 : i32
    %c0_i32_0 = arith.constant 0 : i32
    %c0_i32_1 = arith.constant 0 : i32
    return %c0_i32, %c0_i32_0 : i32, i32
  }
  func.func @transform_3(%arg0: i32) -> (i32, i32) {
    %c0_i32 = arith.constant 0 : i32
    %c0_i32_0 = arith.constant 0 : i32
    %c0_i32_1 = arith.constant 0 : i32
    return %c0_i32, %c0_i32_0 : i32, i32
  }
  func.func @transform_4(%arg0: i32) -> (i32, i32) {
    %c0_i32 = arith.constant 0 : i32
    %c0_i32_0 = arith.constant 0 : i32
    %c0_i32_1 = arith.constant 0 : i32
    return %c0_i32, %c0_i32_0 : i32, i32
  }
  func.func @transform_5(%arg0: i32) -> (i32, i32) {
    %c0_i32 = arith.constant 0 : i32
    %c0_i32_0 = arith.constant 0 : i32
    return %c0_i32, %arg0 : i32, i32
  }
}

</mosaic_0001>

<bundles_post_ra>
// kernel: squeeze.3
= control target key start
LH: loop header
LB: loop body
LE: loop exit
PB: predicated region body
PF: predicated region fallthrough
CT: control target
= control target key end

     0   :  { %s77_s0 = inlined_call_operand.vmem [shape: f32[18], index: 0, kind: input, shape index: {}]   ;;  %s78_s1 = inlined_call_operand.hbm [shape: f32[2,9], index: 1, kind: output, shape index: {}]  }
   0x1   :  { %v6_v0 = vld [vmem:[%s77_s0] sm:$0x1] }
   0x2   :  { %2 = vsyncpa [#allocation1], 0  ;;  %7 = vst [vmem:[#allocation3] sm:$0x1] %v6_v0  ;;  %vm9_vm0 = vcmask 72704   ;;  %s59_s0 = smov 119  }
   0x3   :  { %s60_s8 = smov [#allocation0]  }
   0x4   :  { %s29_s9 = sshll.u32 %s60_s8, 4  ;;  %s30_s9 = int_to_ptr.vmem [resolvable:$true] %s29_s9 }
   0x5   :  { %s37_s10 = scalar_lea.vmem %s30_s9, 32  ;;  %p42_p1 = scmp.lt.s32.totalorder %s30_s9, %s30_s9 }
   0x6   :  { %p38_p0 = scmp.ne.s32.totalorder %s30_s9, %s37_s10  ;;  %p43_p2 = scmp.lt.s32.totalorder %s37_s10, %s37_s10 }
   0x8   :  { %p44_p3 = por %p43_p2, %p42_p1 }
   0x9   :  { %v11_v1 = vld [vmem:[#allocation3] sm:$0x1]  }
   0xa   :  { %v8_v2 = vld [vmem:[#allocation3] sm:$0x1]   ;;  %12 = vrot.lane.b32.xlu0 %v11_v1, %s59_s0  ;;  %p45_p4 = pnand %p44_p3, %p38_p0 }
   0xb   :  { %10 = vst.msk [vmem:[#allocation2] sm:$0x1] %vm9_vm0, %v8_v2  }
  0x7c   :  { %v13_v3 = vpop.permute.xlu0 %12  }
  0x7d   :  { %16 = vst.msk [vmem:[#allocation2 + $0x1] sm:$0x1] %vm9_vm0, %v13_v3  }
  0x84   :  { %v21_v4 = vld [vmem:[#allocation2] sm:$0x3] }
  0x85   :  { %24 = vst [vmem:[#allocation0] sm:$0x3] %v21_v4 }
  0x86   :  { %48 = shalt.err (!%p45_p4)
}
  0x87   :  { %32 = dma.vmem_to_hbm [thread:$0]  %s30_s9, 32, %s78_s1, [#allocation1]  }
  0x88   :  { %57 = dma.done.wait [#allocation1], 32  }
  0x89   :  { %58 = vsyncadd [#allocation1], 4294967264 }
  0x8a   :  { %34 = vsyncpa [#allocation1], 1 }

// kernel: reward_classifier_forward.1
= control target key start
LH: loop header
LB: loop body
LE: loop exit
PB: predicated region body
PF: predicated region fallthrough
CT: control target
= control target key end

     0   :  { %vm84_vm0 = vcmask 261120   ;;  %v511_v3 = vmov 0   ;;  %v512_v4 = vmov 4   ;;  %v513_v18 = vmov 1   ;;  %s686_s0 = inlined_call_operand.vmem [shape: f32[128,32], index: 0, kind: input, shape index: {}]   ;;  %s687_s2 = inlined_call_operand.vmem [shape: bf16[32,32], index: 2, kind: input, shape index: {}]   ;;  %s688_s4 = inlined_call_operand.vmem [shape: f32[32,8], index: 4, kind: input, shape index: {}]   ;;  %s689_s3 = inlined_call_operand.vmem [shape: bf16[32,32], index: 3, kind: input, shape index: {}]   ;;  %s690_s1 = inlined_call_operand.vmem [shape: f32[4,128], index: 1, kind: input, shape index: {}]   ;;  %s691_s5 = inlined_call_operand.vmem [shape: f32[1,128], index: 5, kind: output, shape index: {}]  }
   0x1   :  { %v35_v0 = vld [vmem:[%s686_s0 + $0x70] sm:$0xff]  ;;  %v36_v1 = vld [vmem:[%s686_s0 + $0x78] sm:$0xff]  ;;  %v33_v2 = vld [vmem:[%s686_s0 + $0x60] sm:$0xff]  ;;  %486 = vset.pattern.permute.xlu1 %v511_v3  ;;  %485 = vset.pattern.permute.xlu0 %v512_v4  ;;  %v514_v29 = vmov 2   ;;  %v515_v36 = vmov 3   ;;  %v516_v44 = vmov 5   ;;  %v180_v60 = vlaneseq }
   0x2   :  { %v44_v5 = vpack.c.bf16 %v36_v1, %v35_v0  ;;  %v34_v6 = vld [vmem:[%s686_s0 + $0x68] sm:$0xff]  ;;  %v31_v9 = vld [vmem:[%s686_s0 + $0x50] sm:$0xff]  ;;  %v32_v10 = vld [vmem:[%s686_s0 + $0x58] sm:$0xff]  ;;  %v517_v45 = vmov 6   ;;  %v518_v47 = vmov 7  }
   0x3   :  { %v43_v7 = vpack.c.bf16 %v34_v6, %v33_v2  ;;  %v503_v11 = vld [vmem:[%s687_s2] sm:$0xff]   ;;  %v576_v12 = vld [vmem:[%s688_s4 + $0x10] sm:$0xff]  ;;  %v42_v14 = vpack.c.bf16 %v32_v10, %v31_v9  ;;  %v584_v15 = vld [vmem:[%s688_s4 + $0x18] sm:$0xff]  ;;  %v181_v62 = vshrl.u32 %v180_v60, 7 }
   0x4   :  { %469 = vmatprep.subr.msk.bf16.mxu0 %vm84_vm0, %v44_v5  ;;  %v113_v8 = vsel %vm84_vm0, %v44_v5, 0  ;;  %457 = vmatprep.mubr.msk.bf16.mxu0 %vm84_vm0, %v503_v11  ;;  %v29_v16 = vld [vmem:[%s686_s0 + $0x40] sm:$0xff]  ;;  %v30_v17 = vld [vmem:[%s686_s0 + $0x48] sm:$0xff]  ;;  %v27_v23 = vld [vmem:[%s686_s0 + $0x30] sm:$0xff] }
   0x5   :  { %442 = vmatpush3.bf16.xpose.msra.mxu0 %v113_v8  ;;  %173 = vperm.xlu1 %486, %v576_v12   ;;  %v110_v13 = vsel %vm84_vm0, %v43_v7, 0  ;;  %v599_v19 = vld [vmem:[%s688_s4 + $0x8] sm:$0xff]  ;;  %v107_v20 = vsel %vm84_vm0, %v42_v14, 0  ;;  %v41_v21 = vpack.c.bf16 %v30_v17, %v29_v16  ;;  %v607_v22 = vld [vmem:[%s688_s4] sm:$0xff]  ;;  %v28_v24 = vld [vmem:[%s686_s0 + $0x38] sm:$0xff]  ;;  %v182_v0 = vsub.s32 0, %v181_v62 }
   0x6   :  { %470 = vmatprep.subr.msk.bf16.mxu0 %vm84_vm0, %v43_v7  ;;  %66 = vperm.xlu0 %485, %v576_v12   ;;  %v40_v26 = vpack.c.bf16 %v28_v24, %v27_v23  ;;  %v25_v27 = vld [vmem:[%s686_s0 + $0x20] sm:$0xff]  ;;  %v26_v28 = vld [vmem:[%s686_s0 + $0x28] sm:$0xff]  ;;  %v23_v32 = vld [vmem:[%s686_s0 + $0x10] sm:$0xff]  ;;  %v238_v6 = vsub.s32 2, %v181_v62  ;;  %v266_v8 = vsub.s32 3, %v181_v62 }
   0x7   :  { %v104_v25 = vsel %vm84_vm0, %v41_v21, 0  ;;  %v39_v31 = vpack.c.bf16 %v26_v28, %v25_v27  ;;  %v24_v33 = vld [vmem:[%s686_s0 + $0x18] sm:$0xff]  ;;  %v21_v37 = vld [vmem:[%s686_s0] sm:$0xff]  ;;  %v22_v38 = vld [vmem:[%s686_s0 + $0x8] sm:$0xff] }
   0x8   :  { %v101_v30 = vsel %vm84_vm0, %v40_v26, 0  ;;  %v38_v35 = vpack.c.bf16 %v24_v33, %v23_v32  ;;  %v37_v40 = vpack.c.bf16 %v22_v38, %v21_v37  ;;  %v504_v42 = vld [vmem:[%s687_s2 + $0x8] sm:$0xff]   ;;  %v505_v43 = vld [vmem:[%s689_s3] sm:$0xff]  }
   0x9   :  { %177 = vperm.xlu1 %486, %v584_v15   ;;  %v98_v34 = vsel %vm84_vm0, %v39_v31, 0  ;;  %465 = vmatprep.mubr.msk.bf16.mxu1 %vm84_vm0, %v505_v43  ;;  %v400_v46 = vld [vmem:[%s688_s4] sm:$0x1] }
   0xa   :  { %71 = vperm.xlu0 %485, %v584_v15   ;;  %v95_v39 = vsel %vm84_vm0, %v38_v35, 0  ;;  %v92_v41 = vsel %vm84_vm0, %v37_v40, 0  ;;  %v49_v1 = vld [vmem:[%s690_s1] sm:$0xf] }
   0xb   :  { %v183_v5 = vrot.slane %v49_v1, %v182_v0 }
   0xd   :  { %444 = vmatpush3.bf16.xpose.msra.mxu0 %v110_v13  ;;  %487 = vset.pattern.permute.xlu1 %v513_v18 }
   0xe   :  { %471 = vmatprep.subr.msk.bf16.mxu0 %vm84_vm0, %v42_v14  ;;  %205 = vperm.xlu1 %487, %v584_v15  }
   0xf   :  { %61 = vperm.xlu0 %485, %v599_v19  }
  0x12   :  { %488 = vset.pattern.permute.xlu1 %v512_v4  ;;  %v210_v4 = vsub.s32 1, %v181_v62 }
  0x13   :  { %56 = vperm.xlu1 %488, %v607_v22   ;;  %489 = vset.pattern.permute.xlu0 %v513_v18 }
  0x14   :  { %201 = vperm.xlu0 %489, %v576_v12   ;;  %v211_v7 = vrot.slane %v49_v1, %v210_v4 }
  0x15   :  { %446 = vmatpush3.bf16.xpose.msra.mxu0 %v107_v20 }
  0x16   :  { %472 = vmatprep.subr.msk.bf16.mxu0 %vm84_vm0, %v41_v21 }
  0x17   :  { %490 = vset.pattern.permute.xlu1 %v511_v3 }
  0x18   :  { %165 = vperm.xlu1 %490, %v607_v22   ;;  %197 = vperm.xlu0 %489, %v599_v19  }
  0x1c   :  { %169 = vperm.xlu1 %490, %v599_v19   ;;  %493 = vset.pattern.permute.xlu0 %v514_v29 }
  0x1d   :  { %448 = vmatpush3.bf16.xpose.msra.mxu0 %v104_v25  ;;  %229 = vperm.xlu0 %493, %v576_v12  }
  0x1e   :  { %473 = vmatprep.subr.msk.bf16.mxu0 %vm84_vm0, %v40_v26 }
  0x20   :  { %491 = vset.pattern.permute.xlu1 %v514_v29 }
  0x21   :  { %233 = vperm.xlu1 %491, %v584_v15   ;;  %221 = vperm.xlu0 %493, %v607_v22  }
  0x25   :  { %450 = vmatpush3.bf16.xpose.msra.mxu0 %v101_v30  ;;  %492 = vset.pattern.permute.xlu1 %v513_v18 }
  0x26   :  { %474 = vmatprep.subr.msk.bf16.mxu0 %vm84_vm0, %v39_v31  ;;  %193 = vperm.xlu1 %492, %v607_v22  }
  0x27   :  { %497 = vset.pattern.permute.xlu0 %v515_v36 }
  0x28   :  { %253 = vperm.xlu0 %497, %v599_v19  }
  0x2a   :  { %494 = vset.pattern.permute.xlu1 %v515_v36 }
  0x2b   :  { %257 = vperm.xlu1 %494, %v576_v12  }
  0x2c   :  { %499 = vset.pattern.permute.xlu0 %v516_v44 }
  0x2d   :  { %452 = vmatpush3.bf16.xpose.msra.mxu0 %v98_v34  ;;  %295 = vperm.xlu0 %499, %v576_v12  }
  0x2e   :  { %475 = vmatprep.subr.msk.bf16.mxu0 %vm84_vm0, %v38_v35 }
  0x2f   :  { %261 = vperm.xlu1 %494, %v584_v15  }
  0x31   :  { %501 = vset.pattern.permute.xlu0 %v517_v45 }
  0x32   :  { %376 = vperm.xlu0 %501, %v599_v19  }
  0x33   :  { %495 = vset.pattern.permute.xlu1 %v514_v29 }
  0x34   :  { %225 = vperm.xlu1 %495, %v599_v19  }
  0x35   :  { %454 = vmatpush3.bf16.xpose.msra.mxu0 %v95_v39 }
  0x36   :  { %476 = vmatprep.subr.msk.bf16.mxu0 %vm84_vm0, %v37_v40  ;;  %502 = vset.pattern.permute.xlu0 %v518_v47 }
  0x37   :  { %403 = vperm.xlu0 %502, %v400_v46  }
  0x38   :  { %496 = vset.pattern.permute.xlu1 %v515_v36 }
  0x39   :  { %249 = vperm.xlu1 %496, %v607_v22  }
  0x3d   :  { %456 = vmatpush3.bf16.xpose.msra.mxu0 %v92_v41  ;;  %498 = vset.pattern.permute.xlu1 %v516_v44 }
  0x3e   :  { %287 = vperm.xlu1 %498, %v607_v22  }
  0x42   :  { %291 = vperm.xlu1 %498, %v599_v19  }
  0x44   :  { %458 = vmatmul.mubr.msk.bf16.vlgmr.msra.gmra.mxu0 %vm84_vm0, %v504_v42 }
  0x46   :  { %299 = vperm.xlu1 %498, %v584_v15  }
  0x4a   :  { %500 = vset.pattern.permute.xlu1 %v517_v45 }
  0x4b   :  { %372 = vperm.xlu1 %500, %v607_v22   ;;  %v267_v22 = vrot.slane %v49_v1, %v266_v8 }
  0x4f   :  { %380 = vperm.xlu1 %500, %v576_v12   ;;  %v239_v12 = vrot.slane %v49_v1, %v238_v6 }
  0x53   :  { %384 = vperm.xlu1 %500, %v584_v15  }
  0x80   :  { %v174_v48 = vpop.permute.xlu1 %173 }
  0x81   :  { %v67_v53 = vpop.permute.xlu0 %66  ;;  %v186_v11 = vmul.f32 %v183_v5, %v174_v48 }
  0x84   :  { %v178_v49 = vpop.permute.xlu1 %177 }
  0x85   :  { %v72_v55 = vpop.permute.xlu0 %71  ;;  %v187_v21 = vmul.f32 %v183_v5, %v178_v49 }
  0x89   :  { %v206_v50 = vpop.permute.xlu1 %205 }
  0x8a   :  { %v62_v57 = vpop.permute.xlu0 %61  ;;  %v215_v29 = vmul.f32 %v211_v7, %v206_v50 }
  0x8e   :  { %v57_v51 = vpop.permute.xlu1 %56 }
  0x8f   :  { %v202_v59 = vpop.permute.xlu0 %201 }
  0x90   :  { %v214_v15 = vmul.f32 %v211_v7, %v202_v59 }
  0x93   :  { %v166_v52 = vpop.permute.xlu1 %165  ;;  %v198_v63 = vpop.permute.xlu0 %197 }
  0x94   :  { %v184_v17 = vmul.f32 %v183_v5, %v166_v52  ;;  %v213_v39 = vmul.f32 %v211_v7, %v198_v63 }
  0x97   :  { %v170_v54 = vpop.permute.xlu1 %169 }
  0x98   :  { %v230_v3 = vpop.permute.xlu0 %229  ;;  %v185_v30 = vmul.f32 %v183_v5, %v170_v54 }
  0x99   :  { %v242_v19 = vmul.f32 %v239_v12, %v230_v3 }
  0x9c   :  { %v234_v56 = vpop.permute.xlu1 %233  ;;  %v222_v14 = vpop.permute.xlu0 %221 }
  0x9d   :  { %v240_v24 = vmul.f32 %v239_v12, %v222_v14  ;;  %v243_v38 = vmul.f32 %v239_v12, %v234_v56 }
  0xa1   :  { %v194_v58 = vpop.permute.xlu1 %193 }
  0xa2   :  { %v212_v25 = vmul.f32 %v211_v7, %v194_v58 }
  0xa3   :  { %v254_v37 = vpop.permute.xlu0 %253 }
  0xa4   :  { %v269_v46 = vmul.f32 %v267_v22, %v254_v37 }
  0xa6   :  { %v258_v61 = vpop.permute.xlu1 %257 }
  0xa7   :  { %v270_v40 = vmul.f32 %v267_v22, %v258_v61  ;;  %v506_v61 = vld [vmem:[%s689_s3 + $0x8] sm:$0xff]  }
  0xaa   :  { %v262_v2 = vpop.permute.xlu1 %261 }
  0xab   :  { %v271_v47 = vmul.f32 %v267_v22, %v262_v2  ;;  %v296_v2 = vpop.permute.xlu0 %295 }
  0xaf   :  { %v226_v10 = vpop.permute.xlu1 %225 }
  0xb0   :  { %v241_v41 = vmul.f32 %v239_v12, %v226_v10 }
  0xb4   :  { %v250_v32 = vpop.permute.xlu1 %249 }
  0xb5   :  { %v268_v45 = vmul.f32 %v267_v22, %v250_v32 }
  0xb9   :  { %v288_v62 = vpop.permute.xlu1 %287 }
  0xbd   :  { %v292_v63 = vpop.permute.xlu1 %291 }
  0xc1   :  { %v300_v0 = vpop.permute.xlu1 %299 }
  0xc6   :  { %v373_v3 = vpop.permute.xlu1 %372 }
  0xca   :  { %v381_v12 = vpop.permute.xlu1 %380 }
 0x104   :  { %v459_v9 = vpop.f32.mrf.mxu0 }
 0x105   :  { %v158_v13 = vadd.f32 %v459_v9, %v67_v53 }
 0x106   :  { %v149_v16 = vpop.f32.mrf.mxu0 }
 0x107   :  { %v190_v18 = vadd.f32 %v186_v11, %v158_v13  ;;  %v150_v20 = vadd.f32 %v149_v16, %v57_v51  ;;  %v377_v13 = vpop.permute.xlu0 %376 }
 0x108   :  { %v460_v23 = vpop.f32.mrf.mxu0 }
 0x109   :  { %v218_v26 = vadd.f32 %v214_v15, %v190_v18  ;;  %v188_v27 = vadd.f32 %v184_v17, %v150_v20  ;;  %v161_v28 = vadd.f32 %v460_v23, %v72_v55 }
 0x10a   :  { %v152_v31 = vpop.f32.mrf.mxu0 }
 0x10b   :  { %v246_v33 = vadd.f32 %v242_v19, %v218_v26  ;;  %v191_v34 = vadd.f32 %v187_v21, %v161_v28  ;;  %v216_v35 = vadd.f32 %v212_v25, %v188_v27  ;;  %v153_v36 = vadd.f32 %v152_v31, %v62_v57  ;;  %v385_v21 = vpop.permute.xlu1 %384 }
 0x10d   :  { %v219_v42 = vadd.f32 %v215_v29, %v191_v34  ;;  %v244_v43 = vadd.f32 %v240_v24, %v216_v35  ;;  %v189_v44 = vadd.f32 %v185_v30, %v153_v36  ;;  %v274_v50 = vadd.f32 %v270_v40, %v246_v33  ;;  %v404_v30 = vpop.permute.xlu0 %403 }
 0x10f   :  { %v217_v48 = vadd.f32 %v213_v39, %v189_v44  ;;  %v247_v49 = vadd.f32 %v243_v38, %v219_v42  ;;  %v272_v51 = vadd.f32 %v268_v45, %v244_v43  ;;  %v278_v55 = vmax.f32 %v274_v50, 0.0 }
 0x111   :  { %v245_v52 = vadd.f32 %v241_v41, %v217_v48  ;;  %v275_v53 = vadd.f32 %v271_v47, %v247_v49  ;;  %v276_v58 = vmax.f32 %v272_v51, 0.0 }
 0x113   :  { %v273_v54 = vadd.f32 %v269_v46, %v245_v52  ;;  %v279_v57 = vmax.f32 %v275_v53, 0.0 }
 0x115   :  { %v277_v56 = vmax.f32 %v273_v54, 0.0  ;;  %v285_v59 = vpack.c.bf16 %v279_v57, %v278_v55 }
 0x117   :  { %461 = vmatprep.subr.bf16.mxu1 %v285_v59  ;;  %v284_v60 = vpack.c.bf16 %v277_v56, %v276_v58 }
 0x118   :  { %462 = vmatpush3.bf16.msra.mxu1 %v285_v59 }
 0x119   :  { %463 = vmatprep.subr.bf16.mxu1 %v284_v60 }
 0x11c   :  { %464 = vmatpush3.bf16.msra.mxu1 %v284_v60 }
 0x11f   :  { %466 = vmatmul.mubr.msk.bf16.vlgmr.msra.gmra.mxu1 %vm84_vm0, %v506_v61 }
 0x1df   :  { %v467_v1 = vpop.f32.mrf.mxu1 }
 0x1e0   :  { %v361_v7 = vadd.f32 %v467_v1, %v296_v2 }
 0x1e1   :  { %v352_v4 = vpop.f32.mrf.mxu1 }
 0x1e2   :  { %v353_v5 = vadd.f32 %v352_v4, %v288_v62  ;;  %v369_v14 = vmax.f32 %v361_v7, 0.0 }
 0x1e3   :  { %v468_v6 = vpop.f32.mrf.mxu1 }
 0x1e4   :  { %v367_v9 = vmax.f32 %v353_v5, 0.0  ;;  %v364_v10 = vadd.f32 %v468_v6, %v300_v0  ;;  %v389_v19 = vmul.f32 %v381_v12, %v369_v14 }
 0x1e5   :  { %v355_v8 = vpop.f32.mrf.mxu1 }
 0x1e6   :  { %v356_v11 = vadd.f32 %v355_v8, %v292_v63  ;;  %v387_v16 = vmul.f32 %v373_v3, %v367_v9  ;;  %v370_v17 = vmax.f32 %v364_v10, 0.0 }
 0x1e8   :  { %v368_v15 = vmax.f32 %v356_v11, 0.0  ;;  %v390_v22 = vmul.f32 %v385_v21, %v370_v17 }
 0x1ea   :  { %v388_v18 = vmul.f32 %v377_v13, %v368_v15 }
 0x1ec   :  { %v391_v20 = vadd.f32 %v388_v18, %v387_v16 }
 0x1ee   :  { %v392_v23 = vadd.f32 %v391_v20, %v389_v19 }
 0x1f0   :  { %v393_v24 = vadd.f32 %v392_v23, %v390_v22 }
 0x1f2   :  { %v394_v25 = vrot.slane %v393_v24, 4 }
 0x1f4   :  { %v395_v26 = vadd.f32 %v394_v25, %v393_v24 }
 0x1f6   :  { %v396_v27 = vrot.slane %v395_v26, 2 }
 0x1f8   :  { %v397_v28 = vadd.f32 %v396_v27, %v395_v26 }
 0x1fa   :  { %v398_v29 = vrot.slane %v397_v28, 1 }
 0x1fc   :  { %v399_v31 = vadd.f32 %v398_v29, %v397_v28 }
 0x1fe   :  { %v406_v32 = vadd.f32 %v404_v30, %v399_v31 }
 0x200   :  { %v426_v33 = vmul.f32 -1.442695, %v406_v32 }
 0x202   :  { %507 = vpow2.f32 %v426_v33 }
 0x20f   :  { %v508_v34 = vpop.eup %507 }
 0x210   :  { %v410_v35 = vadd.f32 1.0, %v508_v34 }
 0x212   :  { %509 = vrcp.f32 %v410_v35 }
 0x21f   :  { %v510_v36 = vpop.eup %509 }
 0x220   :  { %413 = vst [vmem:[%s691_s5] sm:$0x1] %v510_v36 }

</bundles_post_ra>
